<compile_context>
chip_gen: v6e
topology: v6e:2x2x1
jax: 0.10.0
libtpu: 0.0.40
codegen_flags: <defaults>
</compile_context>

<pallas_src>
import functools

import jax
import jax.numpy as jnp
from jax import lax
from jax.experimental import pallas as pl
from jax.experimental.pallas import tpu as pltpu


def _vmem_capacity_bytes():
    """Physical VMEM of the local TPU (conservative fallback: 64 MiB = v7x)."""
    try:
        cap = getattr(pltpu.get_tpu_info(), "vmem_capacity_bytes", None)
        if cap:
            return int(cap)
    except Exception:
        pass
    return 64 * 1024 * 1024


def _jsd_kernel(p_ref, o_ref, *, n_ensemble, blocks_per_chunk, block_rows,
                sub_rows, num_sub, valid_rows):
    """Process one (n, block_rows, 128) tile; accumulate (8,128) partial sums."""
    pi = pl.program_id(0)
    ki = pl.program_id(1)

    @pl.when(ki == 0)
    def _():
        o_ref[...] = jnp.zeros_like(o_ref)

    # Unclamped global block index; the index_map clamps the DMA while the mask
    # below zeroes every row past the real extent (incl. whole dummy blocks and the
    # undefined tail of a partial edge block).
    b = pi * blocks_per_chunk + ki
    base = b * block_rows

    inv_n = jnp.float32(1.0 / n_ensemble)
    n_f = jnp.float32(n_ensemble)
    row_ids = lax.broadcasted_iota(jnp.int32, (sub_rows, 128), 0)  # hoisted

    def body(t, acc):
        start = pl.multiple_of(t * sub_rows, sub_rows)
        p = p_ref[:, pl.ds(start, sub_rows), :].astype(jnp.float32)   # (n, sub, 128)
        m = jnp.sum(p, axis=0) * inv_n                                # (sub, 128)
        sum_log_p = jnp.sum(jnp.log(p), axis=0)                       # (sub, 128)
        valid = (base + start + row_ids) < valid_rows
        # sum_i where(m>0, m*(log m - log p_i), 0)
        #   == where(m>0, m*(n*log m - sum_i log p_i), 0), folded per lane column.
        # Note: a genuine p_i == 0 with m > 0 yields +inf, matching PyTorch semantics.
        kl = jnp.where(jnp.logical_and(valid, m > 0.0),
                       m * (n_f * jnp.log(m) - sum_log_p),
                       jnp.float32(0.0))
        # Fold sublane groups with pure VALU adds; single (8,128) vreg out.
        return acc + jnp.sum(kl.reshape(-1, 8, 128), axis=0)

    acc = lax.fori_loop(0, num_sub, body, jnp.zeros((8, 128), jnp.float32),
                        unroll=True)
    o_ref[0] += acc


def jensen_shannon_divergence(ensemble_probs, *, target_block_bytes=None):
    """ensemble_probs: (n, c, h, w) probabilities (NCHW). Returns scalar f32."""
    n, c, h, w = ensemble_probs.shape
    L = c * h * w
    itemsize = jnp.dtype(ensemble_probs.dtype).itemsize
    g = 16 if itemsize < 4 else 8              # sublane packing granularity

    # Flatten to (n, rows, 128); pad ONLY to the 128*g quantum (zeros contribute 0).
    lane_quant = 128 * g
    rows_padded = -(-L // lane_quant) * g
    L_pad = rows_padded * 128
    p2d = ensemble_probs.reshape(n, L)
    padded = L_pad != L
    if padded:
        p2d = jnp.pad(p2d, ((0, 0), (0, L_pad - L)))
    p3d = p2d.reshape(n, rows_padded, 128)

    # Generation-aware block / VMEM budgeting.
    vmem_cap = _vmem_capacity_bytes()
    if vmem_cap >= 100 * 1024 * 1024:          # v5e / v6e: 128 MiB physical VMEM
        default_target, vmem_limit = 8 * 1024 * 1024, 64 * 1024 * 1024
    else:                                       # v7x: 64 MiB physical VMEM
        default_target, vmem_limit = 6 * 1024 * 1024, 40 * 1024 * 1024
    if target_block_bytes is None:
        target_block_bytes = default_target

    row_bytes = n * 128 * itemsize
    # Compute sub-tile (~<=2 MiB of input per step) bounds the f32 temporaries
    # independently of the (large) DMA block size.
    sub_rows = max(g, min(512, ((2 * 1024 * 1024) // row_bytes) // g * g))
    if rows_padded <= sub_rows:
        block_rows = sub_rows = rows_padded
        num_sub = 1
    else:
        tgt_rows = max(sub_rows,
                       (target_block_bytes // row_bytes) // sub_rows * sub_rows)
        block_rows = min(tgt_rows, (rows_padded // sub_rows) * sub_rows)
        num_sub = block_rows // sub_rows

    total_blocks = -(-rows_padded // block_rows)
    # Two chunks whenever there are >=2 blocks of work (both v7x TCs; ~free elsewhere).
    num_par = 2 if total_blocks >= 2 else 1
    blocks_per_chunk = -(-total_blocks // num_par)

    def in_index_map(pi, ki):
        bb = pi * blocks_per_chunk + ki
        return (0, jnp.minimum(bb, total_blocks - 1), 0)

    cost = pl.CostEstimate(
        flops=int(6 * n * L),
        transcendentals=int((n + 1) * L),
        bytes_accessed=int(n * L_pad * itemsize + num_par * 8 * 128 * 4),
    )

    cp_kwargs = dict(dimension_semantics=("parallel", "arbitrary"),
                     vmem_limit_bytes=vmem_limit)
    if padded:
        # Allow XLA to fuse the (rare) lane-alignment pad into the kernel's input.
        cp_kwargs["allow_input_fusion"] = [True]

    partials = pl.pallas_call(
        functools.partial(
            _jsd_kernel,
            n_ensemble=n,
            blocks_per_chunk=blocks_per_chunk,
            block_rows=block_rows,
            sub_rows=sub_rows,
            num_sub=num_sub,
            valid_rows=rows_padded,
        ),
        out_shape=jax.ShapeDtypeStruct((num_par, 8, 128), jnp.float32),
        grid_spec=pltpu.PrefetchScalarGridSpec(
            num_scalar_prefetch=0,
            grid=(num_par, blocks_per_chunk),
            in_specs=[pl.BlockSpec((n, block_rows, 128), in_index_map)],
            out_specs=pl.BlockSpec((1, 8, 128), lambda pi, ki: (pi, 0, 0)),
        ),
        compiler_params=pltpu.CompilerParams(**cp_kwargs),
        cost_estimate=cost,
    )(p3d)

    return jnp.sum(partials) * jnp.float32(1.0 / (h * w))


def _jsd_reference(p):
    n, c, h, w = p.shape
    m = jnp.broadcast_to(jnp.mean(p, axis=0, keepdims=True), p.shape)
    kl = jnp.where(m > 0.0, m * (jnp.log(m) - jnp.log(p)), 0.0)
    return jnp.sum(kl) / (h * w)


if __name__ == "__main__":
    key = jax.random.PRNGKey(0)

    # (shape, block-size override) — covers: aligned single block; lane-padded input
    # with a masked partial tail block across 2 chunks; multi-subtile blocks; and a
    # forced multi-step reduction with a clamped (fully masked) dummy block.
    cases = [
        ((2, 4, 16, 16), None),
        ((2, 4, 129, 130), None),
        ((2, 4, 182, 182), None),
        ((2, 4, 256, 258), 512 * 1024),
    ]
    for idx, (shape, tbb) in enumerate(cases):
        k = jax.random.fold_in(key, idx)
        logits = jax.random.normal(k, shape, dtype=jnp.float32)
        # Proper probability distributions over the channel axis, as the module expects.
        probs = jax.nn.softmax(logits, axis=1)
        out = jax.block_until_ready(
            jensen_shannon_divergence(probs, target_block_bytes=tbb))
        ref = jax.block_until_ready(_jsd_reference(probs))
        assert jnp.allclose(out, ref, rtol=2e-5, atol=1e-6), (shape, out, ref)

    print("KERNEL_OK")
</pallas_src>

<mosaic_0001>
module attributes {stable_mosaic.version = 11 : i64} {
  func.func @_jsd_kernel(%arg0: i32, %arg1: i32, %arg2: memref<2x8x128xf32, #tpu.memory_space<vmem>>, %arg3: memref<1x8x128xf32, #tpu.memory_space<vmem>>) attributes {dimension_semantics = [#tpu.dimension_semantics<parallel>, #tpu.dimension_semantics<arbitrary>], iteration_bounds = array<i64: 1, 1>, scalar_prefetch = 0 : i64, scratch_operands = 0 : i64, tpu.core_type = #tpu.core_type<tc>, window_params = [{transform_indices = @transform_0, window_bounds = array<i64: 2, 8, 128>}, {transform_indices = @transform_1, window_bounds = array<i64: 1, 8, 128>}]} {
    %c0_i32 = arith.constant 0 : i32
    %0 = arith.cmpi eq, %arg1, %c0_i32 : i32
    %1 = arith.extui %0 : i1 to i32
    %c0_i32_0 = arith.constant 0 : i32
    %2 = arith.cmpi ne, %1, %c0_i32_0 : i32
    scf.if %2 {
      %cst_19 = arith.constant 0.000000e+00 : f32
      %41 = vector.broadcast %cst_19 : f32 to vector<1x8x128xf32>
      %c0_20 = arith.constant 0 : index
      %c0_21 = arith.constant 0 : index
      %c0_22 = arith.constant 0 : index
      %42 = vector.load %arg3[%c0_20, %c0_21, %c0_22] : memref<1x8x128xf32, #tpu.memory_space<vmem>>, vector<1x8x128xf32>
      tpu.vector_store %arg3[%c0_20, %c0_21, %c0_22], %41 {strides = array<i32>} : memref<1x8x128xf32, #tpu.memory_space<vmem>>, vector<1x8x128xf32>,
    } else {
    }
    %c1_i32 = arith.constant 1 : i32
    %3 = arith.muli %arg0, %c1_i32 : i32
    %4 = arith.addi %3, %arg1 : i32
    %c8_i32 = arith.constant 8 : i32
    %5 = arith.muli %4, %c8_i32 : i32
    %6 = tpu.iota {dimensions = array<i32: 0>} : vector<8x128xi32>
    %cst = arith.constant 0.000000e+00 : f32
    %7 = vector.broadcast %cst : f32 to vector<8x128xf32>
    %cst_1 = arith.constant 5.000000e-01 : f32
    %cst_2 = arith.constant 2.000000e+00 : f32
    %c0_i32_3 = arith.constant 0 : i32
    %c8_i32_4 = arith.constant 8 : i32
    %8 = arith.muli %c0_i32_3, %c8_i32_4 : i32
    %9 = tpu.assume_multiple %8, 8 : i32
    %c0 = arith.constant 0 : index
    %10 = arith.index_cast %9 : i32 to index
    %c0_5 = arith.constant 0 : index
    %11 = vector.load %arg2[%c0, %10, %c0_5] : memref<2x8x128xf32, #tpu.memory_space<vmem>>, vector<2x8x128xf32>
    %cst_6 = arith.constant dense<0.000000e+00> : vector<8x128xf32>
    %12 = vector.multi_reduction <add>, %11, %cst_6 [0] : vector<2x8x128xf32> to vector<8x128xf32>
    %13 = vector.broadcast %cst_1 : f32 to vector<8x128xf32>
    %14 = arith.mulf %12, %13 : vector<8x128xf32>
    %15 = math.log %11 : vector<2x8x128xf32>
    %cst_7 = arith.constant dense<0.000000e+00> : vector<8x128xf32>
    %16 = vector.multi_reduction <add>, %15, %cst_7 [0] : vector<2x8x128xf32> to vector<8x128xf32>
    %17 = arith.addi %5, %9 : i32
    %18 = vector.broadcast %17 : i32 to vector<8x128xi32>
    %19 = arith.addi %18, %6 : vector<8x128xi32>
    %c8_i32_8 = arith.constant 8 : i32
    %20 = vector.broadcast %c8_i32_8 : i32 to vector<8x128xi32>
    %21 = arith.cmpi slt, %19, %20 : vector<8x128xi32>
    %cst_9 = arith.constant 0.000000e+00 : f32
    %22 = vector.broadcast %cst_9 : f32 to vector<8x128xf32>
    %23 = arith.cmpf ogt, %14, %22 : vector<8x128xf32>
    %24 = arith.andi %21, %23 : vector<8x128xi1>
    %25 = math.log %14 : vector<8x128xf32>
    %26 = vector.broadcast %cst_2 : f32 to vector<8x128xf32>
    %27 = arith.mulf %26, %25 : vector<8x128xf32>
    %28 = arith.subf %27, %16 : vector<8x128xf32>
    %29 = arith.mulf %14, %28 : vector<8x128xf32>
    %cst_10 = arith.constant 0.000000e+00 : f32
    %30 = vector.broadcast %cst_10 : f32 to vector<8x128xf32>
    %31 = arith.select %24, %29, %30 : vector<8x128xi1>, vector<8x128xf32>
    %32 = vector.shape_cast %31 : vector<8x128xf32> to vector<1x8x128xf32>
    %cst_11 = arith.constant dense<0.000000e+00> : vector<8x128xf32>
    %33 = vector.multi_reduction <add>, %32, %cst_11 [0] : vector<1x8x128xf32> to vector<8x128xf32>
    %34 = arith.addf %7, %33 : vector<8x128xf32>
    %c1_i32_12 = arith.constant 1 : i32
    %c0_13 = arith.constant 0 : index
    %c0_14 = arith.constant 0 : index
    %c0_15 = arith.constant 0 : index
    %35 = vector.load %arg3[%c0_13, %c0_14, %c0_15] : memref<1x8x128xf32, #tpu.memory_space<vmem>>, vector<1x8x128xf32>
    %36 = vector.shape_cast %35 : vector<1x8x128xf32> to vector<8x128xf32>
    %37 = arith.addf %36, %34 : vector<8x128xf32>
    %c0_16 = arith.constant 0 : index
    %c0_17 = arith.constant 0 : index
    %c0_18 = arith.constant 0 : index
    %38 = vector.load %arg3[%c0_16, %c0_17, %c0_18] : memref<1x8x128xf32, #tpu.memory_space<vmem>>, vector<1x8x128xf32>
    %39 = vector.shape_cast %38 : vector<1x8x128xf32> to vector<8x128xf32>
    %40 = vector.shape_cast %37 : vector<8x128xf32> to vector<1x8x128xf32>
    tpu.vector_store %arg3[%c0_16, %c0_17, %c0_18], %40 {strides = array<i32>} : memref<1x8x128xf32, #tpu.memory_space<vmem>>, vector<1x8x128xf32>,
    return
  }
  func.func @transform_0(%arg0: i32, %arg1: i32) -> (i32, i32, i32) {
    %c1_i32 = arith.constant 1 : i32
    %0 = arith.muli %arg0, %c1_i32 : i32
    %1 = arith.addi %0, %arg1 : i32
    %c0_i32 = arith.constant 0 : i32
    %2 = arith.minsi %1, %c0_i32 : i32
    %c0_i32_0 = arith.constant 0 : i32
    %c0_i32_1 = arith.constant 0 : i32
    %c0_i32_2 = arith.constant 0 : i32
    return %c0_i32_0, %2, %c0_i32_1 : i32, i32, i32
  }
  func.func @transform_1(%arg0: i32, %arg1: i32) -> (i32, i32, i32) {
    %c0_i32 = arith.constant 0 : i32
    %c0_i32_0 = arith.constant 0 : i32
    %c0_i32_1 = arith.constant 0 : i32
    return %arg0, %c0_i32, %c0_i32_0 : i32, i32, i32
  }
}

</mosaic_0001>

<bundles_post_ra>
// kernel: tpu_custom_call.1
= control target key start
LH: loop header
LB: loop body
LE: loop exit
PB: predicated region body
PF: predicated region fallthrough
CT: control target
= control target key end

     0   :  { %6 = vsyncpa [#allocation3], 0  ;;  %s158_s0 = inlined_call_operand.hbm [shape: f32[2,8,128], index: 0, kind: input, shape index: {}]   ;;  %s159_s1 = inlined_call_operand.hbm [shape: f32[1,8,128], index: 1, kind: output, shape index: {}]  }
   0x1   :  { %7 = vsyncpa [#allocation4], 0  ;;  %s138_s6 = smov [#allocation2]  }
   0x2   :  { %s18_s7 = sshll.u32 %s138_s6, 4  ;;  %s19_s7 = int_to_ptr.vmem [resolvable:$true] %s18_s7 }
   0x3   :  { %s102_s8 = scalar_lea.vmem %s19_s7, 256  ;;  %p107_p1 = scmp.lt.s32.totalorder %s19_s7, %s19_s7 }
   0x4   :  { %p103_p0 = scmp.ne.s32.totalorder %s19_s7, %s102_s8  ;;  %p108_p2 = scmp.lt.s32.totalorder %s102_s8, %s102_s8 }
   0x6   :  { %p109_p3 = por %p108_p2, %p107_p1 }
   0x8   :  { %p110_p4 = pnand %p109_p3, %p103_p0 }
   0xa   :  { %113 = shalt.err (!%p110_p4)
}
   0xb   :  { %s139_s9 = smov 128   ;;  %s140_s10 = smov 8  }
   0xc   :  { %24 = dma.hbm_to_vmem [thread:$0]  %s158_s0, 256, %s19_s7, [#allocation3], %s139_s9, %s139_s9, %s140_s10  }
   0xd   :  { %134 = dma.done.wait [#allocation3], 256  }
   0xe   :  { %135 = vsyncadd [#allocation3], 4294967040  ;;  %v40_v0 = vld [vmem:[#allocation2] sm:$0xff]  ;;  %v41_v1 = vld [vmem:[#allocation2 + $0x8] sm:$0xff]  ;;  %s141_s0 = smov [#allocation5]  }
   0xf   :  { %v42_v2 = vadd.f32 %v41_v1, %v40_v0  ;;  %88 = vlog2.f32 %v40_v0  ;;  %s72_s13 = sshll.u32 %s141_s0, 4  ;;  %s73_s13 = int_to_ptr.vmem [resolvable:$true] %s72_s13 }
  0x10   :  { %90 = vlog2.f32 %v41_v1  ;;  %s114_s14 = scalar_lea.vmem %s73_s13, 128  ;;  %p119_p6 = scmp.lt.s32.totalorder %s73_s13, %s73_s13 }
  0x11   :  { %v43_v3 = vmul.f32 0.5, %v42_v2  ;;  %p115_p5 = scmp.ne.s32.totalorder %s73_s13, %s114_s14  ;;  %p120_p7 = scmp.lt.s32.totalorder %s114_s14, %s114_s14 }
  0x13   :  { %92 = vlog2.f32 %v43_v3  ;;  %vm53_vm0 = vcmp.gt.f32.partialorder %v43_v3, 0.0  ;;  %p121_p8 = por %p120_p7, %p119_p6 }
  0x15   :  { %p122_p9 = pnand %p121_p8, %p115_p5 }
  0x1c   :  { %v89_v4 = vpop.eup %88 }
  0x1d   :  { %v91_v5 = vpop.eup %90  ;;  %v45_v6 = vmul.f32 0.6931472, %v89_v4 }
  0x1e   :  { %v47_v7 = vmul.f32 0.6931472, %v91_v5 }
  0x20   :  { %v93_v8 = vpop.eup %92  ;;  %v48_v9 = vadd.f32 %v47_v7, %v45_v6 }
  0x21   :  { %v56_v10 = vmul.f32 0.6931472, %v93_v8 }
  0x23   :  { %v57_v11 = vmul.f32 2.0, %v56_v10 }
  0x25   :  { %v58_v12 = vsub.f32 %v57_v11, %v48_v9 }
  0x27   :  { %v59_v13 = vmul.f32 %v58_v12, %v43_v3 }
  0x29   :  { %v60_v14 = vsel %vm53_vm0, %v59_v13, 0.0 }
  0x2a   :  { %65 = vst [vmem:[#allocation5] sm:$0xff] %v60_v14 }
  0x2b   :  { %125 = shalt.err (!%p122_p9)
}
  0x2c   :  { %75 = dma.vmem_to_hbm [thread:$0]  %s73_s13, 128, %s159_s1, [#allocation4]  }
  0x2d   :  { %136 = dma.done.wait [#allocation4], 128  }
  0x2e   :  { %137 = vsyncadd [#allocation4], 4294967168 }
  0x2f   :  { %79 = vsyncpa [#allocation3], 1 }
  0x30   :  { %80 = vsyncpa [#allocation4], 1 }

</bundles_post_ra>
